<compile_context>
chip_gen: v6e
topology: v6e:2x2x1
jax: 0.10.0
libtpu: 0.0.40
codegen_flags: <defaults>
</compile_context>

<pallas_src>
import jax
import jax.numpy as jnp
import numpy as np
from jax.experimental import pallas as pl
from jax.experimental.pallas import tpu as pltpu


# ---------------------------------------------------------------------------
# Kernels
# ---------------------------------------------------------------------------
def critic_kernel_small(x_ref, w1_ref, b1_ref, w2_ref, b2_ref, w3r_ref, b3_ref, o_ref):
    """Single-block kernel for small batches: everything already in VMEM.

    x_ref : (B, S)   states
    w*    : [in, out] layouts, biases (1, out)
    w3r   : (1, H)   last-layer weights as a row
    o_ref : (B, 1)
    """
    x = x_ref[...]
    y1 = jnp.dot(x, w1_ref[...], preferred_element_type=jnp.float32) + b1_ref[...]
    y1 = jnp.maximum(y1, 0.0)
    y2 = jnp.dot(y1, w2_ref[...], preferred_element_type=jnp.float32) + b2_ref[...]
    y2 = jnp.maximum(y2, 0.0)
    # H -> 1 layer: VPU multiply + lane reduction (avoids a 1-column MXU matmul).
    o_ref[...] = jnp.sum(y2 * w3r_ref[...], axis=-1, keepdims=True) + b3_ref[...]


def critic_kernel_tiled(xT_ref, w1t_ref, b1c_ref, w2t_ref, b2c_ref, w3r_ref, b3_ref, o_ref):
    """Batch-tiled kernel, batch on the lane / MXU-N axis.

    xT_ref : (S, TB)   transposed state tile (bf16), pipelined over the batch
    w1t    : (H, S)    bf16, VMEM-resident across grid steps
    w2t    : (H, H)    bf16, resident
    w3r    : (1, H)    bf16, resident
    b1c/b2c: (H, 1)    f32 column biases (broadcast over the lane axis)
    b3     : (1, 1)    f32
    o_ref  : (1, 1, TB) lane-dense output block
    """
    x = xT_ref[...]                                                      # (S, TB)
    h1 = jnp.dot(w1t_ref[...], x, preferred_element_type=jnp.float32) + b1c_ref[...]
    h1 = jnp.maximum(h1, 0.0)                                            # (H, TB) f32
    h2 = jnp.dot(w2t_ref[...], h1.astype(w2t_ref.dtype),
                 preferred_element_type=jnp.float32) + b2c_ref[...]
    h2 = jnp.maximum(h2, 0.0)                                            # (H, TB) f32
    v = jnp.dot(w3r_ref[...], h2.astype(w3r_ref.dtype),
                preferred_element_type=jnp.float32) + b3_ref[...]        # (1, TB)
    o_ref[...] = v[None]                                                 # (1, 1, TB)


# ---------------------------------------------------------------------------
# Tiling helper
# ---------------------------------------------------------------------------
def _round_up(x, m):
    return ((x + m - 1) // m) * m


def _choose_tiling(B, max_block_b, min_grid):
    """Pick (n_grid_steps, batch_tile, padded_batch).

    Batch-tile granularity is 128 (lane width), so ragged tails waste at most
    n*128-ish rows instead of a full 1024/8192 tile.  Keep >= 2 grid steps
    when possible so v7x's two TensorCores both get work.
    """
    bp128 = _round_up(B, 128)
    n = max(-(-bp128 // max_block_b), 1)
    if bp128 >= 2 * 128:
        n = max(n, min_grid)
    tb = _round_up(-(-bp128 // n), 128)
    return n, tb, n * tb


# ---------------------------------------------------------------------------
# Wrappers
# ---------------------------------------------------------------------------
def _critic_forward_small(states, params):
    w1, b1, w2, b2, w3, b3 = params
    B = states.shape[0]
    H = w1.shape[1]
    w3r = w3.reshape(1, H)
    vmem = pl.BlockSpec(memory_space=pltpu.MemorySpace.VMEM)
    out = pl.pallas_call(
        critic_kernel_small,
        out_shape=jax.ShapeDtypeStruct((B, 1), jnp.float32),
        in_specs=[vmem] * 7,
        out_specs=vmem,
    )(states, w1, b1, w2, b2, w3r, b3)
    # PyTorch .squeeze(): drops the trailing size-1 dim (and batch dim if B==1)
    return jnp.squeeze(out)


def _critic_forward_tiled(states, params, *, max_block_b=8192, min_grid=2, use_bf16=True):
    w1, b1, w2, b2, w3, b3 = params
    B, S = states.shape
    H = w1.shape[1]

    n, TB, Bp = _choose_tiling(B, max_block_b, min_grid)

    cdt = jnp.bfloat16 if use_bf16 else jnp.float32
    # Transpose once in the wrapper: batch goes onto the lane axis; the (small,
    # <=~n*128 rows) padding and bf16 cast are folded into the same pass.
    x_t = jnp.pad(states, ((0, Bp - B), (0, 0))).T.astype(cdt)   # (S, Bp)
    w1t = w1.T.astype(cdt)                                       # (H, S)
    w2t = w2.T.astype(cdt)                                       # (H, H)
    w3r = w3.reshape(1, H).astype(cdt)                           # (1, H)
    b1c = b1.reshape(H, 1)                                       # f32 column
    b2c = b2.reshape(H, 1)
    b3s = b3.reshape(1, 1)

    out = pl.pallas_call(
        critic_kernel_tiled,
        out_shape=jax.ShapeDtypeStruct((n, 1, TB), jnp.float32),
        grid=(n,),
        in_specs=[
            pl.BlockSpec((S, TB), lambda i: (0, i)),   # state tile: pipelined over batch
            pl.BlockSpec((H, S), lambda i: (0, 0)),    # w1^T: resident
            pl.BlockSpec((H, 1), lambda i: (0, 0)),    # b1 column: resident
            pl.BlockSpec((H, H), lambda i: (0, 0)),    # w2^T: resident
            pl.BlockSpec((H, 1), lambda i: (0, 0)),    # b2 column: resident
            pl.BlockSpec((1, H), lambda i: (0, 0)),    # w3 row: resident
            pl.BlockSpec((1, 1), lambda i: (0, 0)),    # b3: resident
        ],
        out_specs=pl.BlockSpec((1, 1, TB), lambda i: (i, 0, 0)),  # lane-dense (1,TB) block
        compiler_params=pltpu.CompilerParams(
            # Batch axis is embarrassingly parallel -> megacore split on v7x.
            dimension_semantics=("parallel",),
            # Per-step VMEM is < 3 MiB; stay well inside v7x's 64 MiB physical.
            vmem_limit_bytes=32 * 1024 * 1024,
        ),
    )(x_t, w1t, b1c, w2t, b2c, w3r, b3s)

    # (n, 1, TB) row-major flatten reproduces batch order; drop padding.
    return out.reshape(Bp)[:B]


def critic_forward(states, params, *, max_block_b=8192, tiled_threshold=1024,
                   min_grid=2, use_bf16=True):
    """states: [B, state_dim] float32 -> [B] state values (torch .squeeze() semantics)."""
    B = states.shape[0]
    if B >= tiled_threshold:
        return _critic_forward_tiled(states, params, max_block_b=max_block_b,
                                     min_grid=min_grid, use_bf16=use_bf16)
    return _critic_forward_small(states, params)


# ---------------------------------------------------------------------------
# Parameter init (mimics nn.Linear's U(-1/sqrt(fan_in), 1/sqrt(fan_in)))
# ---------------------------------------------------------------------------
def init_params(key, state_dim, hidden_size=64):
    ks = jax.random.split(key, 6)

    def linear(kw, kb, fan_in, fan_out):
        bound = 1.0 / np.sqrt(fan_in)
        w = jax.random.uniform(kw, (fan_in, fan_out), jnp.float32, -bound, bound)
        b = jax.random.uniform(kb, (1, fan_out), jnp.float32, -bound, bound)
        return w, b

    w1, b1 = linear(ks[0], ks[1], state_dim, hidden_size)
    w2, b2 = linear(ks[2], ks[3], hidden_size, hidden_size)
    w3, b3 = linear(ks[4], ks[5], hidden_size, 1)
    return (w1, b1, w2, b2, w3, b3)


# ---------------------------------------------------------------------------
# Demo / correctness check
# ---------------------------------------------------------------------------
if __name__ == "__main__":
    key = jax.random.PRNGKey(0)
    k_small, k_big, k_params = jax.random.split(key, 3)

    state_dim = 16
    hidden = 64
    params = init_params(k_params, state_dim, hidden)
    w1, b1, w2, b2, w3, b3 = params

    def reference_f32(s):
        y1 = jnp.maximum(s @ w1 + b1, 0.0)
        y2 = jnp.maximum(y1 @ w2 + b2, 0.0)
        return jnp.squeeze(y2 @ w3 + b3)

    def reference_bf16(s):
        # Same math as the tiled kernel: bf16 matmul operands, f32 accumulation,
        # f32 bias/ReLU.  (bf16 is numerics-sensitive for PPO training; set
        # use_bf16=False in critic_forward to stay in f32.)
        c = lambda a: a.astype(jnp.bfloat16)
        y1 = jnp.maximum(jnp.dot(c(s), c(w1), preferred_element_type=jnp.float32) + b1, 0.0)
        y2 = jnp.maximum(jnp.dot(c(y1), c(w2), preferred_element_type=jnp.float32) + b2, 0.0)
        return jnp.squeeze(jnp.dot(c(y2), c(w3), preferred_element_type=jnp.float32) + b3)

    # --- small-batch path (single block, f32, no grid) ---
    small_states = jax.random.normal(k_small, (8, state_dim), jnp.float32)
    out_small = jax.block_until_ready(critic_forward(small_states, params))
    assert out_small.shape == (8,)
    np.testing.assert_allclose(
        np.asarray(out_small), np.asarray(reference_f32(small_states)),
        rtol=2e-5, atol=2e-5,
    )

    # --- tiled path (batch on the lane axis, bf16 matmuls, resident weights) ---
    big_b = 2085  # not a multiple of 128 -> exercises the small ragged-tail padding
    big_states = jax.random.normal(k_big, (big_b, state_dim), jnp.float32)
    out_big = jax.block_until_ready(critic_forward(big_states, params))
    assert out_big.shape == (big_b,)
    np.testing.assert_allclose(
        np.asarray(out_big), np.asarray(reference_bf16(big_states)),
        rtol=5e-3, atol=5e-3,
    )

    # --- tiled path again with a small tile cap to exercise a longer grid ---
    out_big2 = jax.block_until_ready(
        critic_forward(big_states, params, max_block_b=512)
    )
    assert out_big2.shape == (big_b,)
    np.testing.assert_allclose(
        np.asarray(out_big2), np.asarray(reference_bf16(big_states)),
        rtol=5e-3, atol=5e-3,
    )

    print("KERNEL_OK")
</pallas_src>

<mosaic_0001>
module attributes {stable_mosaic.version = 11 : i64} {
  func.func @critic_kernel_small(%arg0: memref<8x16xf32, #tpu.memory_space<vmem>>, %arg1: memref<16x64xf32, #tpu.memory_space<vmem>>, %arg2: memref<1x64xf32, #tpu.memory_space<vmem>>, %arg3: memref<64x64xf32, #tpu.memory_space<vmem>>, %arg4: memref<1x64xf32, #tpu.memory_space<vmem>>, %arg5: memref<1x64xf32, #tpu.memory_space<vmem>>, %arg6: memref<1x1xf32, #tpu.memory_space<vmem>>, %arg7: memref<8x1xf32, #tpu.memory_space<vmem>>) attributes {dimension_semantics = [], scalar_prefetch = 0 : i64, scratch_operands = 0 : i64, tpu.core_type = #tpu.core_type<tc>} {
    %c0 = arith.constant 0 : index
    %c0_0 = arith.constant 0 : index
    %0 = vector.load %arg0[%c0, %c0_0] : memref<8x16xf32, #tpu.memory_space<vmem>>, vector<8x16xf32>
    %c0_1 = arith.constant 0 : index
    %c0_2 = arith.constant 0 : index
    %1 = vector.load %arg1[%c0_1, %c0_2] : memref<16x64xf32, #tpu.memory_space<vmem>>, vector<16x64xf32>
    %cst = arith.constant dense<0.000000e+00> : vector<8x64xf32>
    %2 = tpu.matmul %0, %1, %cst {dimension_numbers = #tpu.dot_dimension_numbers<[1], [0], [0], [1], [0, 0, 1, 1], [], []>} : vector<8x16xf32>, vector<16x64xf32>, vector<8x64xf32> -> vector<8x64xf32>
    %c0_3 = arith.constant 0 : index
    %c0_4 = arith.constant 0 : index
    %3 = vector.load %arg2[%c0_3, %c0_4] : memref<1x64xf32, #tpu.memory_space<vmem>>, vector<1x64xf32>
    %4 = vector.broadcast %3 : vector<1x64xf32> to vector<8x64xf32>
    %5 = arith.addf %2, %4 : vector<8x64xf32>
    %cst_5 = arith.constant 0.000000e+00 : f32
    %6 = vector.broadcast %cst_5 : f32 to vector<8x64xf32>
    %7 = arith.maximumf %5, %6 : vector<8x64xf32>
    %c0_6 = arith.constant 0 : index
    %c0_7 = arith.constant 0 : index
    %8 = vector.load %arg3[%c0_6, %c0_7] : memref<64x64xf32, #tpu.memory_space<vmem>>, vector<64x64xf32>
    %cst_8 = arith.constant dense<0.000000e+00> : vector<8x64xf32>
    %9 = tpu.matmul %7, %8, %cst_8 {dimension_numbers = #tpu.dot_dimension_numbers<[1], [0], [0], [1], [0, 0, 1, 1], [], []>} : vector<8x64xf32>, vector<64x64xf32>, vector<8x64xf32> -> vector<8x64xf32>
    %c0_9 = arith.constant 0 : index
    %c0_10 = arith.constant 0 : index
    %10 = vector.load %arg4[%c0_9, %c0_10] : memref<1x64xf32, #tpu.memory_space<vmem>>, vector<1x64xf32>
    %11 = vector.broadcast %10 : vector<1x64xf32> to vector<8x64xf32>
    %12 = arith.addf %9, %11 : vector<8x64xf32>
    %cst_11 = arith.constant 0.000000e+00 : f32
    %13 = vector.broadcast %cst_11 : f32 to vector<8x64xf32>
    %14 = arith.maximumf %12, %13 : vector<8x64xf32>
    %c0_12 = arith.constant 0 : index
    %c0_13 = arith.constant 0 : index
    %15 = vector.load %arg5[%c0_12, %c0_13] : memref<1x64xf32, #tpu.memory_space<vmem>>, vector<1x64xf32>
    %16 = vector.broadcast %15 : vector<1x64xf32> to vector<8x64xf32>
    %17 = arith.mulf %14, %16 : vector<8x64xf32>
    %cst_14 = arith.constant dense<0.000000e+00> : vector<8xf32>
    %18 = vector.multi_reduction <add>, %17, %cst_14 [1] : vector<8x64xf32> to vector<8xf32>
    %19 = vector.shape_cast %18 : vector<8xf32> to vector<8x1xf32>
    %c0_15 = arith.constant 0 : index
    %c0_16 = arith.constant 0 : index
    %20 = vector.load %arg6[%c0_15, %c0_16] : memref<1x1xf32, #tpu.memory_space<vmem>>, vector<1x1xf32>
    %21 = vector.broadcast %20 : vector<1x1xf32> to vector<8x1xf32>
    %22 = arith.addf %19, %21 : vector<8x1xf32>
    %c0_17 = arith.constant 0 : index
    %c0_18 = arith.constant 0 : index
    %23 = vector.load %arg7[%c0_17, %c0_18] : memref<8x1xf32, #tpu.memory_space<vmem>>, vector<8x1xf32>
    tpu.vector_store %arg7[%c0_17, %c0_18], %22 {strides = array<i32>} : memref<8x1xf32, #tpu.memory_space<vmem>>, vector<8x1xf32>,
    return
  }
}

</mosaic_0001>

<bundles_post_ra>
// kernel: tpu_custom_call.1
= control target key start
LH: loop header
LB: loop body
LE: loop exit
PB: predicated region body
PF: predicated region fallthrough
CT: control target
= control target key end

     0   :  { %s455_s0 = inlined_call_operand.hbm [shape: f32[8,16], index: 0, kind: input, shape index: {}]   ;;  %s456_s1 = inlined_call_operand.hbm [shape: f32[16,64], index: 1, kind: input, shape index: {}]   ;;  %s457_s2 = inlined_call_operand.vmem [shape: f32[1,64], index: 2, kind: input, shape index: {}]   ;;  %s458_s3 = inlined_call_operand.hbm [shape: f32[64,64], index: 3, kind: input, shape index: {}]   ;;  %s459_s4 = inlined_call_operand.vmem [shape: f32[1,64], index: 4, kind: input, shape index: {}]   ;;  %s460_s5 = inlined_call_operand.vmem [shape: f32[1,64], index: 5, kind: input, shape index: {}]   ;;  %s461_s6 = inlined_call_operand.<no memory space> [shape: f32[1,1], index: 6, kind: input, shape index: {}]   ;;  %s462_s7 = inlined_call_operand.vmem [shape: f32[8,1], index: 7, kind: output, shape index: {}]  }
   0x1   :  { %v12_v0 = vstv %s461_s6 }
   0x2   :  { %13 = vst [vmem:[#allocation2] sm:$0x1] %v12_v0 }
   0x3   :  { %14 = vsyncpa [#allocation4], 0 }
   0x4   :  { %15 = vsyncpa [#allocation6], 0  ;;  %s384_s26 = smov [#allocation5]  }
   0x5   :  { %s31_s27 = sshll.u32 %s384_s26, 4  ;;  %s32_s27 = int_to_ptr.vmem [resolvable:$true] %s31_s27 }
   0x6   :  { %s328_s28 = scalar_lea.vmem %s32_s27, 256  ;;  %p333_p1 = scmp.lt.s32.totalorder %s32_s27, %s32_s27 }
   0x7   :  { %p329_p0 = scmp.ne.s32.totalorder %s32_s27, %s328_s28  ;;  %p334_p2 = scmp.lt.s32.totalorder %s328_s28, %s328_s28 }
   0x9   :  { %p335_p3 = por %p334_p2, %p333_p1 }
   0xb   :  { %p336_p4 = pnand %p335_p3, %p329_p0 }
   0xd   :  { %339 = shalt.err (!%p336_p4)
}
   0xe   :  { %s385_s29 = smov 128   ;;  %s386_s30 = smov 8  }
   0xf   :  { %37 = dma.hbm_to_vmem [thread:$0]  %s456_s1, 256, %s32_s27, [#allocation6], %s385_s29, %s385_s29, %s386_s30  }
  0x10   :  { %s387_s6 = smov [#allocation3]   ;;  %s388_s11 = smov [#allocation7]  }
  0x11   :  { %s22_s10 = sshll.u32 %s387_s6, 4  ;;  %s45_s12 = sshll.u32 %s388_s11, 4  ;;  %s23_s10 = int_to_ptr.vmem [resolvable:$true] %s22_s10  ;;  %s46_s12 = int_to_ptr.vmem [resolvable:$true] %s45_s12 }
  0x12   :  { %s348_s13 = scalar_lea.vmem %s23_s10, 128  ;;  %p353_p6 = scmp.lt.s32.totalorder %s23_s10, %s23_s10 }
  0x13   :  { %p349_p5 = scmp.ne.s32.totalorder %s23_s10, %s348_s13  ;;  %p354_p7 = scmp.lt.s32.totalorder %s348_s13, %s348_s13 }
  0x15   :  { %p355_p8 = por %p354_p7, %p353_p6 }
  0x17   :  { %p356_p9 = pnand %p355_p8, %p349_p5 }
  0x19   :  { %359 = shalt.err (!%p356_p9)
}
  0x1a   :  { %25 = dma.hbm_to_vmem [thread:$0]  %s455_s0, 128, %s23_s10, [#allocation4]  }
  0x1b   :  { %s368_s16 = scalar_lea.vmem %s46_s12, 1024  ;;  %p373_p11 = scmp.lt.s32.totalorder %s46_s12, %s46_s12 }
  0x1c   :  { %p369_p10 = scmp.ne.s32.totalorder %s46_s12, %s368_s16  ;;  %p374_p12 = scmp.lt.s32.totalorder %s368_s16, %s368_s16 }
  0x1e   :  { %p375_p13 = por %p374_p12, %p373_p11 }
  0x20   :  { %p376_p0 = pnand %p375_p13, %p369_p10 }
  0x22   :  { %379 = shalt.err (!%p376_p0)
}
  0x23   :  { %51 = dma.hbm_to_vmem [thread:$0]  %s458_s3, 1024, %s46_s12, [#allocation6], %s385_s29, %s385_s29, %s386_s30  }
  0x24   :  { %380 = dma.done.wait [#allocation4], 128  }
  0x25   :  { %381 = vsyncadd [#allocation4], 4294967168 }
  0x26   :  { %382 = dma.done.wait [#allocation6], 1280  }
  0x27   :  { %383 = vsyncadd [#allocation6], 4294966016  ;;  %v389_v1 = vmov 0.0   ;;  %vm390_vm0 = vmmov 0   ;;  %v69_v2 = vld [vmem:[#allocation5 + $0x8] sm:$0xff]  ;;  %v68_v3 = vld [vmem:[#allocation5] sm:$0xff] }
  0x28   :  { %287 = vmatprep.subr.mxu0 %v389_v1  ;;  %291 = vmatprep.mubr.msk.f32.mxu0 %vm390_vm0, %v389_v1  ;;  %v67_v4 = vld [vmem:[#allocation3] sm:$0xff]  ;;  %vm77_vm1 = vcmask 130048   ;;  %v159_v5 = vld [vmem:[#allocation7 + $0x38] sm:$0xff]  ;;  %v158_v6 = vld [vmem:[#allocation7 + $0x30] sm:$0xff]  ;;  %vm167_vm2 = vcmask 523264   ;;  %vm261_vm3 = vcmask 7168  }
  0x29   :  { %294 = vmatprep.subr.mxu1 %v389_v1  ;;  %310 = vmatprep.mubr.msk.f32.mxu1 %vm390_vm0, %v389_v1  ;;  %v157_v7 = vld [vmem:[#allocation7 + $0x28] sm:$0xff]  ;;  %v156_v8 = vld [vmem:[#allocation7 + $0x20] sm:$0xff]  ;;  %v155_v9 = vld [vmem:[#allocation7 + $0x18] sm:$0xff] }
  0x2a   :  { %288 = vmatpush3.msra.mxu0 %v69_v2  ;;  %295 = vmatpush3.msra.mxu1 %v159_v5  ;;  %v154_v10 = vld [vmem:[#allocation7 + $0x10] sm:$0xff]  ;;  %v153_v11 = vld [vmem:[#allocation7 + $0x8] sm:$0xff]  ;;  %v152_v12 = vld [vmem:[#allocation7] sm:$0xff] }
  0x2b   :  { %289 = vmatprep.subr.mxu0 %v389_v1  ;;  %296 = vmatprep.subr.mxu1 %v389_v1  ;;  %v269_v13 = vld [vmem:[%s457_s2] ss:$0 sm:$0xff] }
  0x2c   :  { %290 = vmatpush3.msra.mxu0 %v68_v3  ;;  %297 = vmatpush3.msra.mxu1 %v158_v6  ;;  %v271_v18 = vld [vmem:[%s459_s4] ss:$0 sm:$0xff] }
  0x2d   :  { %292 = vmatmul.mubr.msk.f32.vlgmr.msra.gmra.mxu0 %vm77_vm1, %v67_v4  ;;  %298 = vmatprep.subr.mxu1 %v389_v1  ;;  %v273_v22 = vld [vmem:[%s460_s5] ss:$0 sm:$0xff] }
  0x2e   :  { %299 = vmatpush3.msra.mxu1 %v157_v7  ;;  %v274_v26 = vld [vmem:[#allocation2] ss:$0 sm:$0xff] }
  0x2f   :  { %300 = vmatprep.subr.mxu1 %v389_v1 }
  0x30   :  { %301 = vmatpush3.msra.mxu1 %v156_v8 }
  0x31   :  { %302 = vmatprep.subr.mxu1 %v389_v1 }
  0x32   :  { %303 = vmatpush3.msra.mxu1 %v155_v9 }
  0x33   :  { %304 = vmatprep.subr.mxu1 %v389_v1 }
  0x34   :  { %305 = vmatpush3.msra.mxu1 %v154_v10 }
  0x35   :  { %306 = vmatprep.subr.mxu1 %v389_v1 }
  0x36   :  { %307 = vmatpush3.msra.mxu1 %v153_v11 }
  0x37   :  { %308 = vmatprep.subr.mxu1 %v389_v1 }
  0x38   :  { %309 = vmatpush3.msra.mxu1 %v152_v12 }
  0xed   :  { %v147_v14 = vpop.f32.mrf.mxu0 }
  0xee   :  { %v148_v15 = vadd.f32 %v269_v13, %v147_v14 }
  0xef   :  { %v293_v16 = vpop.f32.mrf.mxu0 }
  0xf0   :  { %v151_v17 = vmax.f32 %v148_v15, 0.0 }
  0xf2   :  { %311 = vmatmul.mubr.msk.f32.vlgmr.msra.gmra.mxu1 %vm167_vm2, %v151_v17 }
 0x1b2   :  { %v237_v19 = vpop.f32.mrf.mxu1 }
 0x1b3   :  { %v238_v20 = vadd.f32 %v271_v18, %v237_v19 }
 0x1b4   :  { %v312_v21 = vpop.f32.mrf.mxu1 }
 0x1b5   :  { %v241_v23 = vmax.f32 %v238_v20, 0.0 }
 0x1b7   :  { %v249_v24 = vmul.f32 %v273_v22, %v241_v23 }
 0x1b9   :  { %v250_v25 = vsel %vm167_vm2, %v249_v24, 0.0 }
 0x1ba   :  { %251 = vadd.xlane.f32.xlu0 %v250_v25 }
 0x243   :  { %v252_v27 = vpop.xlane.xlu0 %251 }
 0x244   :  { %v260_v28 = vadd.f32 %v274_v26, %v252_v27 }
 0x246   :  { %262 = vst.msk [vmem:[%s462_s7] sm:$0xff] %vm261_vm3, %v260_v28 }
 0x247   :  { %267 = vsyncpa [#allocation4], 1 }
 0x248   :  { %268 = vsyncpa [#allocation6], 1 }

</bundles_post_ra>
